<compile_context>
chip_gen: v6e
topology: v6e:2x2x1
jax: 0.10.0
libtpu: 0.0.40
codegen_flags: <defaults>
</compile_context>

<pallas_src>
import math
import functools

import jax
import jax.numpy as jnp
from jax import lax
from jax.experimental import pallas as pl
from jax.experimental.pallas import tpu as pltpu

NEG_SLOPE = 0.01  # nn.LeakyReLU() default negative_slope


def _leaky_relu(x):
    return jnp.where(x >= 0, x, NEG_SLOPE * x)


def _resblock_kernel(x_ref, w1_ref, b1_ref, w2_ref, b2_ref, mask_ref, o_ref,
                     xbuf, hbuf, *, offsets, W, ML, MR, L, pad, dilate):
    """Fused ResBlock for one batch element.

    x_ref    : (1, Cin, H*W)       input image, spatial dense in lanes
    w*_ref   : (ksz*ksz, Cout, Cin) per-tap weight matrices
    b*_ref   : (Cout, 1)
    mask_ref : (ksz, H*W)          per-column validity masks (one per kw)
    o_ref    : (1, Cin, H*W)
    xbuf     : (Cin, ML + H*W + MR) flat input with zeroed halo margins (f32)
    hbuf     : (Cf , ML + H*W + MR) flat conv1 activation, zeroed margins
    """
    # Zero the halo margins every step (cheap; keeps megacore-split grids
    # correct since scratch is per-core).  Margin reads then contribute 0.
    for buf in (xbuf, hbuf):
        c = buf.shape[0]
        buf[:, 0:ML] = jnp.zeros((c, ML), jnp.float32)
        buf[:, ML + L:ML + L + MR] = jnp.zeros((c, MR), jnp.float32)

    # Stage the whole image with one lane-aligned copy (no per-row loop).
    xbuf[:, ML:ML + L] = x_ref[0].astype(jnp.float32)

    def conv(buf, w_ref, b_ref):
        # Bias-initialised accumulator; each tap is a weight-stationary
        # (Cout, Cin) @ (Cin, L) matmul over the lane-shifted flat window.
        acc = b_ref[...]                                       # (Cout, 1)
        for t, (dh, dw) in enumerate(offsets):
            start = ML + dh * W + dw                           # static
            win = buf[:, start:start + L]                      # (Cin_src, L)
            if dw != 0:
                # mask out columns that wrapped across a row boundary
                kw = (dw + pad) // dilate
                win = win * mask_ref[kw:kw + 1, :]
            acc = acc + jnp.dot(w_ref[t], win,
                                preferred_element_type=jnp.float32)
        return acc                                             # (Cout, L) f32

    # conv1 + LeakyReLU -> stays in VMEM (single aligned store)
    hbuf[:, ML:ML + L] = _leaky_relu(conv(xbuf, w1_ref, b1_ref))

    # conv2 + residual + LeakyReLU, single lane-dense writeback
    y = conv(hbuf, w2_ref, b2_ref) + xbuf[:, ML:ML + L]
    o_ref[0, :, :] = _leaky_relu(y).astype(o_ref.dtype)


def resblock_forward(x_nchw, params, *, dilate=1):
    """ResBlock.forward.  Input/output are NCHW, like the PyTorch module."""
    N, Cin, H, W = x_nchw.shape
    w1, b1, w2, b2 = params["w1"], params["b1"], params["w2"], params["b2"]
    Cf, _, ksz, _ = w1.shape
    assert ksz % 2 == 1, "even kernel sizes break the 'same'-size residual"
    pad = ksz // 2 + dilate - 1
    span = (ksz - 1) * dilate + 1
    assert (H + 2 * pad - span + 1, W + 2 * pad - span + 1) == (H, W), \
        "residual shape mismatch"

    L = H * W
    T = ksz * ksz
    offsets = tuple((kh * dilate - pad, kw * dilate - pad)
                    for kh in range(ksz) for kw in range(ksz))

    margin = pad * W + pad                       # max |lane shift| of any tap
    ML = ((margin + 127) // 128) * 128           # lane-aligned staging offset
    ML = max(ML, 128)
    MR = ML
    TOT = ML + L + MR

    # per-tap weight matrices, tap-major: (ksz*ksz, Cout, Cin)
    w1t = jnp.transpose(w1, (2, 3, 0, 1)).reshape(T, Cf, Cin).astype(jnp.float32)
    w2t = jnp.transpose(w2, (2, 3, 0, 1)).reshape(T, Cin, Cf).astype(jnp.float32)
    b1c = b1.reshape(Cf, 1).astype(jnp.float32)
    b2c = b2.reshape(Cin, 1).astype(jnp.float32)

    # per-kw column masks: valid iff 0 <= w + dw < W  (row violations already
    # land in the zeroed margins, so only the column condition is needed)
    ww = jnp.arange(W)[None, :]                                  # (1, W)
    col_masks = []
    for kw in range(ksz):
        dw = kw * dilate - pad
        m = ((ww + dw >= 0) & (ww + dw < W)).astype(jnp.float32)  # (1, W)
        col_masks.append(jnp.tile(m, (H, 1)).reshape(L))
    mask_arr = jnp.stack(col_masks, axis=0)                      # (ksz, L)

    x_flat = x_nchw.reshape(N, Cin, L)            # free reshape, no transpose

    kern = functools.partial(_resblock_kernel, offsets=offsets, W=W,
                             ML=ML, MR=MR, L=L, pad=pad, dilate=dilate)

    # TODO(synk): for large images, additionally tile H across the grid with
    # haloed blocks so the pipeline has >2 steps and per-step VMEM stays
    # bounded (re-derive the H-tile for v7x's 64 MiB VMEM).
    out_flat = pl.pallas_call(
        kern,
        out_shape=jax.ShapeDtypeStruct((N, Cin, L), x_nchw.dtype),
        grid=(N,),
        in_specs=[
            pl.BlockSpec((1, Cin, L), lambda n: (n, 0, 0)),
            pl.BlockSpec((T, Cf, Cin), lambda n: (0, 0, 0)),
            pl.BlockSpec((Cf, 1), lambda n: (0, 0)),
            pl.BlockSpec((T, Cin, Cf), lambda n: (0, 0, 0)),
            pl.BlockSpec((Cin, 1), lambda n: (0, 0)),
            pl.BlockSpec((ksz, L), lambda n: (0, 0)),
        ],
        out_specs=pl.BlockSpec((1, Cin, L), lambda n: (n, 0, 0)),
        scratch_shapes=[pltpu.VMEM((Cin, TOT), jnp.float32),
                        pltpu.VMEM((Cf, TOT), jnp.float32)],
        compiler_params=pltpu.CompilerParams(
            dimension_semantics=("parallel",)),
    )(x_flat, w1t, b1c, w2t, b2c, mask_arr)

    return out_flat.reshape(N, Cin, H, W)


# ---------------------------------------------------------------------------
# deterministic parameter init (kaiming_uniform_ fan_out / relu + PyTorch's
# default conv bias init), stored in PyTorch-native OIHW layout.
# ---------------------------------------------------------------------------
def _kaiming_uniform_fanout(key, cout, cin, ksz):
    fan_out = cout * ksz * ksz
    bound = math.sqrt(2.0) * math.sqrt(3.0 / fan_out)
    return jax.random.uniform(key, (cout, cin, ksz, ksz), jnp.float32, -bound, bound)


def _conv_bias_init(key, cin, ksz, cout):
    bound = 1.0 / math.sqrt(cin * ksz * ksz)
    return jax.random.uniform(key, (cout,), jnp.float32, -bound, bound)


def init_resblock_params(key, in_ch, f_ch, f_sz):
    k1, k2, k3, k4 = jax.random.split(key, 4)
    return {
        "w1": _kaiming_uniform_fanout(k1, f_ch, in_ch, f_sz),
        "b1": _conv_bias_init(k2, in_ch, f_sz, f_ch),
        "w2": _kaiming_uniform_fanout(k3, in_ch, f_ch, f_sz),
        "b2": _conv_bias_init(k4, f_ch, f_sz, in_ch),
    }


# ---------------------------------------------------------------------------
# pure-JAX reference (lax.conv) for correctness checking
# ---------------------------------------------------------------------------
def _resblock_ref(x_nchw, params, *, dilate=1):
    ksz = params["w1"].shape[2]
    pad = ksz // 2 + dilate - 1
    dn = ("NCHW", "OIHW", "NCHW")

    def conv(x, w, b):
        y = lax.conv_general_dilated(
            x, w, window_strides=(1, 1),
            padding=((pad, pad), (pad, pad)),
            rhs_dilation=(dilate, dilate),
            dimension_numbers=dn)
        return y + b[None, :, None, None]

    h = jax.nn.leaky_relu(conv(x_nchw, params["w1"], params["b1"]), NEG_SLOPE)
    y = conv(h, params["w2"], params["b2"])
    return jax.nn.leaky_relu(x_nchw + y, NEG_SLOPE)


if __name__ == "__main__":
    in_ch, f_ch, f_sz = 4, 8, 3
    N, H, W = 2, 16, 16

    key = jax.random.PRNGKey(0)
    kx, kp = jax.random.split(key)
    x = jax.random.normal(kx, (N, in_ch, H, W), jnp.float32)
    params = init_resblock_params(kp, in_ch, f_ch, f_sz)

    for dilate in (1, 2):
        out = jax.block_until_ready(resblock_forward(x, params, dilate=dilate))
        ref = _resblock_ref(x, params, dilate=dilate)
        assert out.shape == ref.shape == (N, in_ch, H, W)
        assert jnp.allclose(out, ref, atol=1e-4, rtol=1e-4), \
            f"mismatch vs JAX reference (dilate={dilate})"

    print("KERNEL_OK")
</pallas_src>

<mosaic_0001>
module attributes {stable_mosaic.version = 11 : i64} {
  func.func @_resblock_kernel(%arg0: i32, %arg1: memref<1x4x256xf32, #tpu.memory_space<vmem>>, %arg2: memref<9x8x4xf32, #tpu.memory_space<vmem>>, %arg3: memref<8x1xf32, #tpu.memory_space<vmem>>, %arg4: memref<9x4x8xf32, #tpu.memory_space<vmem>>, %arg5: memref<4x1xf32, #tpu.memory_space<vmem>>, %arg6: memref<3x256xf32, #tpu.memory_space<vmem>>, %arg7: memref<1x4x256xf32, #tpu.memory_space<vmem>>, %arg8: memref<4x512xf32, #tpu.memory_space<vmem>>, %arg9: memref<8x512xf32, #tpu.memory_space<vmem>>) attributes {dimension_semantics = [#tpu.dimension_semantics<parallel>], iteration_bounds = array<i64: 2>, scalar_prefetch = 0 : i64, scratch_operands = 2 : i64, tpu.core_type = #tpu.core_type<tc>, window_params = [{transform_indices = @transform_0, window_bounds = array<i64: 1, 4, 256>}, {pipeline_mode = #tpu.pipeline_mode<synchronous>, transform_indices = @transform_1, window_bounds = array<i64: 9, 8, 4>}, {pipeline_mode = #tpu.pipeline_mode<synchronous>, transform_indices = @transform_2, window_bounds = array<i64: 8, 1>}, {pipeline_mode = #tpu.pipeline_mode<synchronous>, transform_indices = @transform_3, window_bounds = array<i64: 9, 4, 8>}, {pipeline_mode = #tpu.pipeline_mode<synchronous>, transform_indices = @transform_4, window_bounds = array<i64: 4, 1>}, {pipeline_mode = #tpu.pipeline_mode<synchronous>, transform_indices = @transform_5, window_bounds = array<i64: 3, 256>}, {transform_indices = @transform_6, window_bounds = array<i64: 1, 4, 256>}]} {
    %cst = arith.constant 0.000000e+00 : f32
    %0 = vector.broadcast %cst : f32 to vector<4x128xf32>
    %c0 = arith.constant 0 : index
    %c0_0 = arith.constant 0 : index
    %1 = vector.load %arg8[%c0, %c0_0] : memref<4x512xf32, #tpu.memory_space<vmem>>, vector<4x128xf32>
    tpu.vector_store %arg8[%c0, %c0_0], %0 {strides = array<i32>} : memref<4x512xf32, #tpu.memory_space<vmem>>, vector<4x128xf32>,
    %cst_1 = arith.constant 0.000000e+00 : f32
    %2 = vector.broadcast %cst_1 : f32 to vector<4x128xf32>
    %c0_2 = arith.constant 0 : index
    %c384 = arith.constant 384 : index
    %3 = vector.load %arg8[%c0_2, %c384] : memref<4x512xf32, #tpu.memory_space<vmem>>, vector<4x128xf32>
    tpu.vector_store %arg8[%c0_2, %c384], %2 {strides = array<i32>} : memref<4x512xf32, #tpu.memory_space<vmem>>, vector<4x128xf32>,
    %cst_3 = arith.constant 0.000000e+00 : f32
    %4 = vector.broadcast %cst_3 : f32 to vector<8x128xf32>
    %c0_4 = arith.constant 0 : index
    %c0_5 = arith.constant 0 : index
    %5 = vector.load %arg9[%c0_4, %c0_5] : memref<8x512xf32, #tpu.memory_space<vmem>>, vector<8x128xf32>
    tpu.vector_store %arg9[%c0_4, %c0_5], %4 {strides = array<i32>} : memref<8x512xf32, #tpu.memory_space<vmem>>, vector<8x128xf32>,
    %cst_6 = arith.constant 0.000000e+00 : f32
    %6 = vector.broadcast %cst_6 : f32 to vector<8x128xf32>
    %c0_7 = arith.constant 0 : index
    %c384_8 = arith.constant 384 : index
    %7 = vector.load %arg9[%c0_7, %c384_8] : memref<8x512xf32, #tpu.memory_space<vmem>>, vector<8x128xf32>
    tpu.vector_store %arg9[%c0_7, %c384_8], %6 {strides = array<i32>} : memref<8x512xf32, #tpu.memory_space<vmem>>, vector<8x128xf32>,
    %c0_9 = arith.constant 0 : index
    %c0_10 = arith.constant 0 : index
    %c0_11 = arith.constant 0 : index
    %8 = vector.load %arg1[%c0_9, %c0_10, %c0_11] : memref<1x4x256xf32, #tpu.memory_space<vmem>>, vector<1x4x256xf32>
    %9 = vector.shape_cast %8 : vector<1x4x256xf32> to vector<4x256xf32>
    %c0_12 = arith.constant 0 : index
    %c128 = arith.constant 128 : index
    %10 = vector.load %arg8[%c0_12, %c128] : memref<4x512xf32, #tpu.memory_space<vmem>>, vector<4x256xf32>
    tpu.vector_store %arg8[%c0_12, %c128], %9 {strides = array<i32>} : memref<4x512xf32, #tpu.memory_space<vmem>>, vector<4x256xf32>,
    %c0_13 = arith.constant 0 : index
    %c0_14 = arith.constant 0 : index
    %11 = vector.load %arg3[%c0_13, %c0_14] : memref<8x1xf32, #tpu.memory_space<vmem>>, vector<8x1xf32>
    %c0_15 = arith.constant 0 : index
    %c111 = arith.constant 111 : index
    %12 = vector.load %arg8[%c0_15, %c111] : memref<4x512xf32, #tpu.memory_space<vmem>>, vector<4x256xf32>
    %c0_16 = arith.constant 0 : index
    %c0_17 = arith.constant 0 : index
    %13 = vector.load %arg6[%c0_16, %c0_17] : memref<3x256xf32, #tpu.memory_space<vmem>>, vector<1x256xf32>
    %14 = vector.broadcast %13 : vector<1x256xf32> to vector<4x256xf32>
    %15 = arith.mulf %12, %14 : vector<4x256xf32>
    %c0_18 = arith.constant 0 : index
    %c0_19 = arith.constant 0 : index
    %c0_20 = arith.constant 0 : index
    %16 = vector.load %arg2[%c0_18, %c0_19, %c0_20] : memref<9x8x4xf32, #tpu.memory_space<vmem>>, vector<1x8x4xf32>
    %17 = vector.shape_cast %16 : vector<1x8x4xf32> to vector<8x4xf32>
    %cst_21 = arith.constant dense<0.000000e+00> : vector<8x256xf32>
    %18 = tpu.matmul %17, %15, %cst_21 {dimension_numbers = #tpu.dot_dimension_numbers<[1], [0], [0], [1], [0, 0, 1, 1], [], []>} : vector<8x4xf32>, vector<4x256xf32>, vector<8x256xf32> -> vector<8x256xf32>
    %19 = vector.broadcast %11 : vector<8x1xf32> to vector<8x256xf32>
    %20 = arith.addf %19, %18 : vector<8x256xf32>
    %c0_22 = arith.constant 0 : index
    %c112 = arith.constant 112 : index
    %21 = vector.load %arg8[%c0_22, %c112] : memref<4x512xf32, #tpu.memory_space<vmem>>, vector<4x256xf32>
    %c1 = arith.constant 1 : index
    %c0_23 = arith.constant 0 : index
    %c0_24 = arith.constant 0 : index
    %22 = vector.load %arg2[%c1, %c0_23, %c0_24] : memref<9x8x4xf32, #tpu.memory_space<vmem>>, vector<1x8x4xf32>
    %23 = vector.shape_cast %22 : vector<1x8x4xf32> to vector<8x4xf32>
    %cst_25 = arith.constant dense<0.000000e+00> : vector<8x256xf32>
    %24 = tpu.matmul %23, %21, %cst_25 {dimension_numbers = #tpu.dot_dimension_numbers<[1], [0], [0], [1], [0, 0, 1, 1], [], []>} : vector<8x4xf32>, vector<4x256xf32>, vector<8x256xf32> -> vector<8x256xf32>
    %25 = arith.addf %20, %24 : vector<8x256xf32>
    %c0_26 = arith.constant 0 : index
    %c113 = arith.constant 113 : index
    %26 = vector.load %arg8[%c0_26, %c113] : memref<4x512xf32, #tpu.memory_space<vmem>>, vector<4x256xf32>
    %c2 = arith.constant 2 : index
    %c0_27 = arith.constant 0 : index
    %27 = vector.load %arg6[%c2, %c0_27] : memref<3x256xf32, #tpu.memory_space<vmem>>, vector<1x256xf32>
    %28 = vector.broadcast %27 : vector<1x256xf32> to vector<4x256xf32>
    %29 = arith.mulf %26, %28 : vector<4x256xf32>
    %c2_28 = arith.constant 2 : index
    %c0_29 = arith.constant 0 : index
    %c0_30 = arith.constant 0 : index
    %30 = vector.load %arg2[%c2_28, %c0_29, %c0_30] : memref<9x8x4xf32, #tpu.memory_space<vmem>>, vector<1x8x4xf32>
    %31 = vector.shape_cast %30 : vector<1x8x4xf32> to vector<8x4xf32>
    %cst_31 = arith.constant dense<0.000000e+00> : vector<8x256xf32>
    %32 = tpu.matmul %31, %29, %cst_31 {dimension_numbers = #tpu.dot_dimension_numbers<[1], [0], [0], [1], [0, 0, 1, 1], [], []>} : vector<8x4xf32>, vector<4x256xf32>, vector<8x256xf32> -> vector<8x256xf32>
    %33 = arith.addf %25, %32 : vector<8x256xf32>
    %c0_32 = arith.constant 0 : index
    %c127 = arith.constant 127 : index
    %34 = vector.load %arg8[%c0_32, %c127] : memref<4x512xf32, #tpu.memory_space<vmem>>, vector<4x256xf32>
    %c0_33 = arith.constant 0 : index
    %c0_34 = arith.constant 0 : index
    %35 = vector.load %arg6[%c0_33, %c0_34] : memref<3x256xf32, #tpu.memory_space<vmem>>, vector<1x256xf32>
    %36 = vector.broadcast %35 : vector<1x256xf32> to vector<4x256xf32>
    %37 = arith.mulf %34, %36 : vector<4x256xf32>
    %c3 = arith.constant 3 : index
    %c0_35 = arith.constant 0 : index
    %c0_36 = arith.constant 0 : index
    %38 = vector.load %arg2[%c3, %c0_35, %c0_36] : memref<9x8x4xf32, #tpu.memory_space<vmem>>, vector<1x8x4xf32>
    %39 = vector.shape_cast %38 : vector<1x8x4xf32> to vector<8x4xf32>
    %cst_37 = arith.constant dense<0.000000e+00> : vector<8x256xf32>
    %40 = tpu.matmul %39, %37, %cst_37 {dimension_numbers = #tpu.dot_dimension_numbers<[1], [0], [0], [1], [0, 0, 1, 1], [], []>} : vector<8x4xf32>, vector<4x256xf32>, vector<8x256xf32> -> vector<8x256xf32>
    %41 = arith.addf %33, %40 : vector<8x256xf32>
    %c0_38 = arith.constant 0 : index
    %c128_39 = arith.constant 128 : index
    %42 = vector.load %arg8[%c0_38, %c128_39] : memref<4x512xf32, #tpu.memory_space<vmem>>, vector<4x256xf32>
    %c4 = arith.constant 4 : index
    %c0_40 = arith.constant 0 : index
    %c0_41 = arith.constant 0 : index
    %43 = vector.load %arg2[%c4, %c0_40, %c0_41] : memref<9x8x4xf32, #tpu.memory_space<vmem>>, vector<1x8x4xf32>
    %44 = vector.shape_cast %43 : vector<1x8x4xf32> to vector<8x4xf32>
    %cst_42 = arith.constant dense<0.000000e+00> : vector<8x256xf32>
    %45 = tpu.matmul %44, %42, %cst_42 {dimension_numbers = #tpu.dot_dimension_numbers<[1], [0], [0], [1], [0, 0, 1, 1], [], []>} : vector<8x4xf32>, vector<4x256xf32>, vector<8x256xf32> -> vector<8x256xf32>
    %46 = arith.addf %41, %45 : vector<8x256xf32>
    %c0_43 = arith.constant 0 : index
    %c129 = arith.constant 129 : index
    %47 = vector.load %arg8[%c0_43, %c129] : memref<4x512xf32, #tpu.memory_space<vmem>>, vector<4x256xf32>
    %c2_44 = arith.constant 2 : index
    %c0_45 = arith.constant 0 : index
    %48 = vector.load %arg6[%c2_44, %c0_45] : memref<3x256xf32, #tpu.memory_space<vmem>>, vector<1x256xf32>
    %49 = vector.broadcast %48 : vector<1x256xf32> to vector<4x256xf32>
    %50 = arith.mulf %47, %49 : vector<4x256xf32>
    %c5 = arith.constant 5 : index
    %c0_46 = arith.constant 0 : index
    %c0_47 = arith.constant 0 : index
    %51 = vector.load %arg2[%c5, %c0_46, %c0_47] : memref<9x8x4xf32, #tpu.memory_space<vmem>>, vector<1x8x4xf32>
    %52 = vector.shape_cast %51 : vector<1x8x4xf32> to vector<8x4xf32>
    %cst_48 = arith.constant dense<0.000000e+00> : vector<8x256xf32>
    %53 = tpu.matmul %52, %50, %cst_48 {dimension_numbers = #tpu.dot_dimension_numbers<[1], [0], [0], [1], [0, 0, 1, 1], [], []>} : vector<8x4xf32>, vector<4x256xf32>, vector<8x256xf32> -> vector<8x256xf32>
    %54 = arith.addf %46, %53 : vector<8x256xf32>
    %c0_49 = arith.constant 0 : index
    %c143 = arith.constant 143 : index
    %55 = vector.load %arg8[%c0_49, %c143] : memref<4x512xf32, #tpu.memory_space<vmem>>, vector<4x256xf32>
    %c0_50 = arith.constant 0 : index
    %c0_51 = arith.constant 0 : index
    %56 = vector.load %arg6[%c0_50, %c0_51] : memref<3x256xf32, #tpu.memory_space<vmem>>, vector<1x256xf32>
    %57 = vector.broadcast %56 : vector<1x256xf32> to vector<4x256xf32>
    %58 = arith.mulf %55, %57 : vector<4x256xf32>
    %c6 = arith.constant 6 : index
    %c0_52 = arith.constant 0 : index
    %c0_53 = arith.constant 0 : index
    %59 = vector.load %arg2[%c6, %c0_52, %c0_53] : memref<9x8x4xf32, #tpu.memory_space<vmem>>, vector<1x8x4xf32>
    %60 = vector.shape_cast %59 : vector<1x8x4xf32> to vector<8x4xf32>
    %cst_54 = arith.constant dense<0.000000e+00> : vector<8x256xf32>
    %61 = tpu.matmul %60, %58, %cst_54 {dimension_numbers = #tpu.dot_dimension_numbers<[1], [0], [0], [1], [0, 0, 1, 1], [], []>} : vector<8x4xf32>, vector<4x256xf32>, vector<8x256xf32> -> vector<8x256xf32>
    %62 = arith.addf %54, %61 : vector<8x256xf32>
    %c0_55 = arith.constant 0 : index
    %c144 = arith.constant 144 : index
    %63 = vector.load %arg8[%c0_55, %c144] : memref<4x512xf32, #tpu.memory_space<vmem>>, vector<4x256xf32>
    %c7 = arith.constant 7 : index
    %c0_56 = arith.constant 0 : index
    %c0_57 = arith.constant 0 : index
    %64 = vector.load %arg2[%c7, %c0_56, %c0_57] : memref<9x8x4xf32, #tpu.memory_space<vmem>>, vector<1x8x4xf32>
    %65 = vector.shape_cast %64 : vector<1x8x4xf32> to vector<8x4xf32>
    %cst_58 = arith.constant dense<0.000000e+00> : vector<8x256xf32>
    %66 = tpu.matmul %65, %63, %cst_58 {dimension_numbers = #tpu.dot_dimension_numbers<[1], [0], [0], [1], [0, 0, 1, 1], [], []>} : vector<8x4xf32>, vector<4x256xf32>, vector<8x256xf32> -> vector<8x256xf32>
    %67 = arith.addf %62, %66 : vector<8x256xf32>
    %c0_59 = arith.constant 0 : index
    %c145 = arith.constant 145 : index
    %68 = vector.load %arg8[%c0_59, %c145] : memref<4x512xf32, #tpu.memory_space<vmem>>, vector<4x256xf32>
    %c2_60 = arith.constant 2 : index
    %c0_61 = arith.constant 0 : index
    %69 = vector.load %arg6[%c2_60, %c0_61] : memref<3x256xf32, #tpu.memory_space<vmem>>, vector<1x256xf32>
    %70 = vector.broadcast %69 : vector<1x256xf32> to vector<4x256xf32>
    %71 = arith.mulf %68, %70 : vector<4x256xf32>
    %c8 = arith.constant 8 : index
    %c0_62 = arith.constant 0 : index
    %c0_63 = arith.constant 0 : index
    %72 = vector.load %arg2[%c8, %c0_62, %c0_63] : memref<9x8x4xf32, #tpu.memory_space<vmem>>, vector<1x8x4xf32>
    %73 = vector.shape_cast %72 : vector<1x8x4xf32> to vector<8x4xf32>
    %cst_64 = arith.constant dense<0.000000e+00> : vector<8x256xf32>
    %74 = tpu.matmul %73, %71, %cst_64 {dimension_numbers = #tpu.dot_dimension_numbers<[1], [0], [0], [1], [0, 0, 1, 1], [], []>} : vector<8x4xf32>, vector<4x256xf32>, vector<8x256xf32> -> vector<8x256xf32>
    %75 = arith.addf %67, %74 : vector<8x256xf32>
    %cst_65 = arith.constant 0.000000e+00 : f32
    %76 = vector.broadcast %cst_65 : f32 to vector<8x256xf32>
    %77 = arith.cmpf oge, %75, %76 : vector<8x256xf32>
    %cst_66 = arith.constant 0.00999999977 : f32
    %78 = vector.broadcast %cst_66 : f32 to vector<8x256xf32>
    %79 = arith.mulf %78, %75 : vector<8x256xf32>
    %80 = arith.select %77, %75, %79 : vector<8x256xi1>, vector<8x256xf32>
    %c0_67 = arith.constant 0 : index
    %c128_68 = arith.constant 128 : index
    %81 = vector.load %arg9[%c0_67, %c128_68] : memref<8x512xf32, #tpu.memory_space<vmem>>, vector<8x256xf32>
    tpu.vector_store %arg9[%c0_67, %c128_68], %80 {strides = array<i32>} : memref<8x512xf32, #tpu.memory_space<vmem>>, vector<8x256xf32>,
    %c0_69 = arith.constant 0 : index
    %c0_70 = arith.constant 0 : index
    %82 = vector.load %arg5[%c0_69, %c0_70] : memref<4x1xf32, #tpu.memory_space<vmem>>, vector<4x1xf32>
    %c0_71 = arith.constant 0 : index
    %c111_72 = arith.constant 111 : index
    %83 = vector.load %arg9[%c0_71, %c111_72] : memref<8x512xf32, #tpu.memory_space<vmem>>, vector<8x256xf32>
    %c0_73 = arith.constant 0 : index
    %c0_74 = arith.constant 0 : index
    %84 = vector.load %arg6[%c0_73, %c0_74] : memref<3x256xf32, #tpu.memory_space<vmem>>, vector<1x256xf32>
    %85 = vector.broadcast %84 : vector<1x256xf32> to vector<8x256xf32>
    %86 = arith.mulf %83, %85 : vector<8x256xf32>
    %c0_75 = arith.constant 0 : index
    %c0_76 = arith.constant 0 : index
    %c0_77 = arith.constant 0 : index
    %87 = vector.load %arg4[%c0_75, %c0_76, %c0_77] : memref<9x4x8xf32, #tpu.memory_space<vmem>>, vector<1x4x8xf32>
    %88 = vector.shape_cast %87 : vector<1x4x8xf32> to vector<4x8xf32>
    %cst_78 = arith.constant dense<0.000000e+00> : vector<4x256xf32>
    %89 = tpu.matmul %88, %86, %cst_78 {dimension_numbers = #tpu.dot_dimension_numbers<[1], [0], [0], [1], [0, 0, 1, 1], [], []>} : vector<4x8xf32>, vector<8x256xf32>, vector<4x256xf32> -> vector<4x256xf32>
    %90 = vector.broadcast %82 : vector<4x1xf32> to vector<4x256xf32>
    %91 = arith.addf %90, %89 : vector<4x256xf32>
    %c0_79 = arith.constant 0 : index
    %c112_80 = arith.constant 112 : index
    %92 = vector.load %arg9[%c0_79, %c112_80] : memref<8x512xf32, #tpu.memory_space<vmem>>, vector<8x256xf32>
    %c1_81 = arith.constant 1 : index
    %c0_82 = arith.constant 0 : index
    %c0_83 = arith.constant 0 : index
    %93 = vector.load %arg4[%c1_81, %c0_82, %c0_83] : memref<9x4x8xf32, #tpu.memory_space<vmem>>, vector<1x4x8xf32>
    %94 = vector.shape_cast %93 : vector<1x4x8xf32> to vector<4x8xf32>
    %cst_84 = arith.constant dense<0.000000e+00> : vector<4x256xf32>
    %95 = tpu.matmul %94, %92, %cst_84 {dimension_numbers = #tpu.dot_dimension_numbers<[1], [0], [0], [1], [0, 0, 1, 1], [], []>} : vector<4x8xf32>, vector<8x256xf32>, vector<4x256xf32> -> vector<4x256xf32>
    %96 = arith.addf %91, %95 : vector<4x256xf32>
    %c0_85 = arith.constant 0 : index
    %c113_86 = arith.constant 113 : index
    %97 = vector.load %arg9[%c0_85, %c113_86] : memref<8x512xf32, #tpu.memory_space<vmem>>, vector<8x256xf32>
    %c2_87 = arith.constant 2 : index
    %c0_88 = arith.constant 0 : index
    %98 = vector.load %arg6[%c2_87, %c0_88] : memref<3x256xf32, #tpu.memory_space<vmem>>, vector<1x256xf32>
    %99 = vector.broadcast %98 : vector<1x256xf32> to vector<8x256xf32>
    %100 = arith.mulf %97, %99 : vector<8x256xf32>
    %c2_89 = arith.constant 2 : index
    %c0_90 = arith.constant 0 : index
    %c0_91 = arith.constant 0 : index
    %101 = vector.load %arg4[%c2_89, %c0_90, %c0_91] : memref<9x4x8xf32, #tpu.memory_space<vmem>>, vector<1x4x8xf32>
    %102 = vector.shape_cast %101 : vector<1x4x8xf32> to vector<4x8xf32>
    %cst_92 = arith.constant dense<0.000000e+00> : vector<4x256xf32>
    %103 = tpu.matmul %102, %100, %cst_92 {dimension_numbers = #tpu.dot_dimension_numbers<[1], [0], [0], [1], [0, 0, 1, 1], [], []>} : vector<4x8xf32>, vector<8x256xf32>, vector<4x256xf32> -> vector<4x256xf32>
    %104 = arith.addf %96, %103 : vector<4x256xf32>
    %c0_93 = arith.constant 0 : index
    %c127_94 = arith.constant 127 : index
    %105 = vector.load %arg9[%c0_93, %c127_94] : memref<8x512xf32, #tpu.memory_space<vmem>>, vector<8x256xf32>
    %c0_95 = arith.constant 0 : index
    %c0_96 = arith.constant 0 : index
    %106 = vector.load %arg6[%c0_95, %c0_96] : memref<3x256xf32, #tpu.memory_space<vmem>>, vector<1x256xf32>
    %107 = vector.broadcast %106 : vector<1x256xf32> to vector<8x256xf32>
    %108 = arith.mulf %105, %107 : vector<8x256xf32>
    %c3_97 = arith.constant 3 : index
    %c0_98 = arith.constant 0 : index
    %c0_99 = arith.constant 0 : index
    %109 = vector.load %arg4[%c3_97, %c0_98, %c0_99] : memref<9x4x8xf32, #tpu.memory_space<vmem>>, vector<1x4x8xf32>
    %110 = vector.shape_cast %109 : vector<1x4x8xf32> to vector<4x8xf32>
    %cst_100 = arith.constant dense<0.000000e+00> : vector<4x256xf32>
    %111 = tpu.matmul %110, %108, %cst_100 {dimension_numbers = #tpu.dot_dimension_numbers<[1], [0], [0], [1], [0, 0, 1, 1], [], []>} : vector<4x8xf32>, vector<8x256xf32>, vector<4x256xf32> -> vector<4x256xf32>
    %112 = arith.addf %104, %111 : vector<4x256xf32>
    %c0_101 = arith.constant 0 : index
    %c128_102 = arith.constant 128 : index
    %113 = vector.load %arg9[%c0_101, %c128_102] : memref<8x512xf32, #tpu.memory_space<vmem>>, vector<8x256xf32>
    %c4_103 = arith.constant 4 : index
    %c0_104 = arith.constant 0 : index
    %c0_105 = arith.constant 0 : index
    %114 = vector.load %arg4[%c4_103, %c0_104, %c0_105] : memref<9x4x8xf32, #tpu.memory_space<vmem>>, vector<1x4x8xf32>
    %115 = vector.shape_cast %114 : vector<1x4x8xf32> to vector<4x8xf32>
    %cst_106 = arith.constant dense<0.000000e+00> : vector<4x256xf32>
    %116 = tpu.matmul %115, %113, %cst_106 {dimension_numbers = #tpu.dot_dimension_numbers<[1], [0], [0], [1], [0, 0, 1, 1], [], []>} : vector<4x8xf32>, vector<8x256xf32>, vector<4x256xf32> -> vector<4x256xf32>
    %117 = arith.addf %112, %116 : vector<4x256xf32>
    %c0_107 = arith.constant 0 : index
    %c129_108 = arith.constant 129 : index
    %118 = vector.load %arg9[%c0_107, %c129_108] : memref<8x512xf32, #tpu.memory_space<vmem>>, vector<8x256xf32>
    %c2_109 = arith.constant 2 : index
    %c0_110 = arith.constant 0 : index
    %119 = vector.load %arg6[%c2_109, %c0_110] : memref<3x256xf32, #tpu.memory_space<vmem>>, vector<1x256xf32>
    %120 = vector.broadcast %119 : vector<1x256xf32> to vector<8x256xf32>
    %121 = arith.mulf %118, %120 : vector<8x256xf32>
    %c5_111 = arith.constant 5 : index
    %c0_112 = arith.constant 0 : index
    %c0_113 = arith.constant 0 : index
    %122 = vector.load %arg4[%c5_111, %c0_112, %c0_113] : memref<9x4x8xf32, #tpu.memory_space<vmem>>, vector<1x4x8xf32>
    %123 = vector.shape_cast %122 : vector<1x4x8xf32> to vector<4x8xf32>
    %cst_114 = arith.constant dense<0.000000e+00> : vector<4x256xf32>
    %124 = tpu.matmul %123, %121, %cst_114 {dimension_numbers = #tpu.dot_dimension_numbers<[1], [0], [0], [1], [0, 0, 1, 1], [], []>} : vector<4x8xf32>, vector<8x256xf32>, vector<4x256xf32> -> vector<4x256xf32>
    %125 = arith.addf %117, %124 : vector<4x256xf32>
    %c0_115 = arith.constant 0 : index
    %c143_116 = arith.constant 143 : index
    %126 = vector.load %arg9[%c0_115, %c143_116] : memref<8x512xf32, #tpu.memory_space<vmem>>, vector<8x256xf32>
    %c0_117 = arith.constant 0 : index
    %c0_118 = arith.constant 0 : index
    %127 = vector.load %arg6[%c0_117, %c0_118] : memref<3x256xf32, #tpu.memory_space<vmem>>, vector<1x256xf32>
    %128 = vector.broadcast %127 : vector<1x256xf32> to vector<8x256xf32>
    %129 = arith.mulf %126, %128 : vector<8x256xf32>
    %c6_119 = arith.constant 6 : index
    %c0_120 = arith.constant 0 : index
    %c0_121 = arith.constant 0 : index
    %130 = vector.load %arg4[%c6_119, %c0_120, %c0_121] : memref<9x4x8xf32, #tpu.memory_space<vmem>>, vector<1x4x8xf32>
    %131 = vector.shape_cast %130 : vector<1x4x8xf32> to vector<4x8xf32>
    %cst_122 = arith.constant dense<0.000000e+00> : vector<4x256xf32>
    %132 = tpu.matmul %131, %129, %cst_122 {dimension_numbers = #tpu.dot_dimension_numbers<[1], [0], [0], [1], [0, 0, 1, 1], [], []>} : vector<4x8xf32>, vector<8x256xf32>, vector<4x256xf32> -> vector<4x256xf32>
    %133 = arith.addf %125, %132 : vector<4x256xf32>
    %c0_123 = arith.constant 0 : index
    %c144_124 = arith.constant 144 : index
    %134 = vector.load %arg9[%c0_123, %c144_124] : memref<8x512xf32, #tpu.memory_space<vmem>>, vector<8x256xf32>
    %c7_125 = arith.constant 7 : index
    %c0_126 = arith.constant 0 : index
    %c0_127 = arith.constant 0 : index
    %135 = vector.load %arg4[%c7_125, %c0_126, %c0_127] : memref<9x4x8xf32, #tpu.memory_space<vmem>>, vector<1x4x8xf32>
    %136 = vector.shape_cast %135 : vector<1x4x8xf32> to vector<4x8xf32>
    %cst_128 = arith.constant dense<0.000000e+00> : vector<4x256xf32>
    %137 = tpu.matmul %136, %134, %cst_128 {dimension_numbers = #tpu.dot_dimension_numbers<[1], [0], [0], [1], [0, 0, 1, 1], [], []>} : vector<4x8xf32>, vector<8x256xf32>, vector<4x256xf32> -> vector<4x256xf32>
    %138 = arith.addf %133, %137 : vector<4x256xf32>
    %c0_129 = arith.constant 0 : index
    %c145_130 = arith.constant 145 : index
    %139 = vector.load %arg9[%c0_129, %c145_130] : memref<8x512xf32, #tpu.memory_space<vmem>>, vector<8x256xf32>
    %c2_131 = arith.constant 2 : index
    %c0_132 = arith.constant 0 : index
    %140 = vector.load %arg6[%c2_131, %c0_132] : memref<3x256xf32, #tpu.memory_space<vmem>>, vector<1x256xf32>
    %141 = vector.broadcast %140 : vector<1x256xf32> to vector<8x256xf32>
    %142 = arith.mulf %139, %141 : vector<8x256xf32>
    %c8_133 = arith.constant 8 : index
    %c0_134 = arith.constant 0 : index
    %c0_135 = arith.constant 0 : index
    %143 = vector.load %arg4[%c8_133, %c0_134, %c0_135] : memref<9x4x8xf32, #tpu.memory_space<vmem>>, vector<1x4x8xf32>
    %144 = vector.shape_cast %143 : vector<1x4x8xf32> to vector<4x8xf32>
    %cst_136 = arith.constant dense<0.000000e+00> : vector<4x256xf32>
    %145 = tpu.matmul %144, %142, %cst_136 {dimension_numbers = #tpu.dot_dimension_numbers<[1], [0], [0], [1], [0, 0, 1, 1], [], []>} : vector<4x8xf32>, vector<8x256xf32>, vector<4x256xf32> -> vector<4x256xf32>
    %146 = arith.addf %138, %145 : vector<4x256xf32>
    %c0_137 = arith.constant 0 : index
    %c128_138 = arith.constant 128 : index
    %147 = vector.load %arg8[%c0_137, %c128_138] : memref<4x512xf32, #tpu.memory_space<vmem>>, vector<4x256xf32>
    %148 = arith.addf %146, %147 : vector<4x256xf32>
    %cst_139 = arith.constant 0.000000e+00 : f32
    %149 = vector.broadcast %cst_139 : f32 to vector<4x256xf32>
    %150 = arith.cmpf oge, %148, %149 : vector<4x256xf32>
    %cst_140 = arith.constant 0.00999999977 : f32
    %151 = vector.broadcast %cst_140 : f32 to vector<4x256xf32>
    %152 = arith.mulf %151, %148 : vector<4x256xf32>
    %153 = arith.select %150, %148, %152 : vector<4x256xi1>, vector<4x256xf32>
    %c0_141 = arith.constant 0 : index
    %c0_142 = arith.constant 0 : index
    %c0_143 = arith.constant 0 : index
    %154 = vector.load %arg7[%c0_141, %c0_142, %c0_143] : memref<1x4x256xf32, #tpu.memory_space<vmem>>, vector<1x4x256xf32>
    %155 = vector.shape_cast %154 : vector<1x4x256xf32> to vector<4x256xf32>
    %156 = vector.shape_cast %153 : vector<4x256xf32> to vector<1x4x256xf32>
    tpu.vector_store %arg7[%c0_141, %c0_142, %c0_143], %156 {strides = array<i32>} : memref<1x4x256xf32, #tpu.memory_space<vmem>>, vector<1x4x256xf32>,
    return
  }
  func.func @transform_0(%arg0: i32) -> (i32, i32, i32) {
    %c0_i32 = arith.constant 0 : i32
    %c0_i32_0 = arith.constant 0 : i32
    %c0_i32_1 = arith.constant 0 : i32
    return %arg0, %c0_i32, %c0_i32_0 : i32, i32, i32
  }
  func.func @transform_1(%arg0: i32) -> (i32, i32, i32) {
    %c0_i32 = arith.constant 0 : i32
    %c0_i32_0 = arith.constant 0 : i32
    %c0_i32_1 = arith.constant 0 : i32
    %c0_i32_2 = arith.constant 0 : i32
    return %c0_i32, %c0_i32_0, %c0_i32_1 : i32, i32, i32
  }
  func.func @transform_2(%arg0: i32) -> (i32, i32) {
    %c0_i32 = arith.constant 0 : i32
    %c0_i32_0 = arith.constant 0 : i32
    %c0_i32_1 = arith.constant 0 : i32
    return %c0_i32, %c0_i32_0 : i32, i32
  }
  func.func @transform_3(%arg0: i32) -> (i32, i32, i32) {
    %c0_i32 = arith.constant 0 : i32
    %c0_i32_0 = arith.constant 0 : i32
    %c0_i32_1 = arith.constant 0 : i32
    %c0_i32_2 = arith.constant 0 : i32
    return %c0_i32, %c0_i32_0, %c0_i32_1 : i32, i32, i32
  }
  func.func @transform_4(%arg0: i32) -> (i32, i32) {
    %c0_i32 = arith.constant 0 : i32
    %c0_i32_0 = arith.constant 0 : i32
    %c0_i32_1 = arith.constant 0 : i32
    return %c0_i32, %c0_i32_0 : i32, i32
  }
  func.func @transform_5(%arg0: i32) -> (i32, i32) {
    %c0_i32 = arith.constant 0 : i32
    %c0_i32_0 = arith.constant 0 : i32
    %c0_i32_1 = arith.constant 0 : i32
    return %c0_i32, %c0_i32_0 : i32, i32
  }
  func.func @transform_6(%arg0: i32) -> (i32, i32, i32) {
    %c0_i32 = arith.constant 0 : i32
    %c0_i32_0 = arith.constant 0 : i32
    %c0_i32_1 = arith.constant 0 : i32
    return %arg0, %c0_i32, %c0_i32_0 : i32, i32, i32
  }
}

</mosaic_0001>

<bundles_post_ra>
// kernel: tpu_custom_call.1
= control target key start
LH: loop header
LB: loop body
LE: loop exit
PB: predicated region body
PF: predicated region fallthrough
CT: control target
= control target key end

     0   :  { %11 = vsyncpa [#allocation5], 0  ;;  %s2827_s0 = inlined_call_operand.vmem [shape: f32[2,4,256], index: 0, kind: input, shape index: {}]   ;;  %s2828_s1 = inlined_call_operand.vmem [shape: f32[9,8,4], index: 1, kind: input, shape index: {}]   ;;  %s2829_s2 = inlined_call_operand.vmem [shape: f32[8,1], index: 2, kind: input, shape index: {}]   ;;  %s2830_s3 = inlined_call_operand.vmem [shape: f32[9,4,8], index: 3, kind: input, shape index: {}]   ;;  %s2831_s4 = inlined_call_operand.vmem [shape: f32[4,1], index: 4, kind: input, shape index: {}]   ;;  %s2832_s5 = inlined_call_operand.vmem [shape: f32[3,256], index: 5, kind: input, shape index: {}]   ;;  %s2833_s6 = inlined_call_operand.hbm [shape: f32[2,4,256], index: 6, kind: output, shape index: {}]  }
   0x1   :  { %13 = vsyncpa [#allocation5 + $0x1], 0  ;;  %s2418_s21 = smov 0   ;;  %s2420_s22 = smov 0  }
   0x2   :  { %s2422_s23 = smov 0   ;;  %s2424_s24 = smov 0  }
   0x3 LB: > { %s2439_s25 = sadd.s32 4294967295, %s2370_s24   ;;  %s2190_s26 = sadd.s32 4294967294, %s2370_s24   ;;  %s2370_s24 = sphi %s2424_s24, %s2839_s24   ;;  %s2366_s23 = sphi %s2422_s23, %s2838_s23   ;;  %s2362_s22 = sphi %s2420_s22, %s2837_s22   ;;  %s2358_s21 = sphi %s2418_s21, %s2836_s21  }
   0x4   : > { %s2443_s27 = sadd.s32 1, %s2370_s24   ;;  %s157_s28 = sadd.s32 1, %s2366_s23 }
   0x5   : > { %s154_s29 = ssub.s32 %s2370_s24, %s2443_s27  ;;  %p167_p0 = scmp.ne.s32.totalorder %s2366_s23, %s2362_s22 }
   0x6   : > { %p155_p1 = scmp.eq.s32.totalorder %s154_s29, 0  ;;  %p168_p2 = scmp.eq.s32.totalorder %s2439_s25, 1 }
   0x7   : > { %p173_p3 = scmp.ne.s32.totalorder %s2362_s22, %s2358_s21  ;;  %p174_p4 = scmp.eq.s32.totalorder %s2190_s26, 1 }
   0x8   : > { %s2454_s30 = scalar_select %p155_p1, %s2366_s23, %s157_s28  }
   0x9   : > { %p2456_p5 = por %p168_p2, %p167_p0  ;;  %p2460_p6 = por %p174_p4, %p173_p3 }
   0xa   : > { %p2193_p7 = scmp.ge.s32.totalorder %s2370_s24, 1  ;;  %p215_p8 = scmp.lt.s32.totalorder %s2370_s24, 3 }
   0xc   : > { %p216_p9 = pnand %p2193_p7, %p215_p8 }
   0xd   : > { %p245_p10 = scmp.lt.s32.totalorder (!%p216_p9), %s2439_s25, 1  ;;  %s2373_s18 = smov (!%p216_p9), 111  }
   0xe   : > { %219 = sbr.rel (%p216_p9) target bundleno = 873 (0x369), region = 44  ;;  %s2374_s19 = smov (!%p216_p9), 127  }
   0xf   : > { %s2375_s20 = smov (!%p216_p9), 113   ;;  %s2376_s26 = smov (!%p216_p9), 1  }
  0x10   : > { %s2377_s28 = smov (!%p216_p9), 15   ;;  %s2378_s29 = smov (!%p216_p9), 17  }
  0x11   : > { %s2379_s9 = smov (!%p216_p9), 16   ;;  %s2380_s10 = smov (!%p216_p9), 112  }
  0x13   : > { %v261_v0 = vlaneseq  ;;  %v2372_v1 = vmov 0.0   ;;  %v259_v2 = vld [vmem:[%s2832_s5] ss:$4 sm:$0x3]  ;;  %s246_s13 = scalar_select %p245_p10, %s2439_s25, 1  ;;  %vm273_vm0 = vcmask 908288  }
  0x14   : > { %250 = vst [vmem:[#allocation2] sm:$0xf] %v2372_v1  ;;  %251 = vst [vmem:[#allocation2 + $0xc] sm:$0xf] %v2372_v1  ;;  %466 = vmatprep.mubr.f32.mxu1 %v2372_v1  ;;  %365 = vmatprep.mubr.f32.mxu0 %v2372_v1  ;;  %vm597_vm1 = vcmask 1039360   ;;  %vm492_vm2 = vcmask 924672  }
  0x15   : > { %v262_v3 = vshrl.u32 %v261_v0, 7  ;;  %v2204_v4 = vld [vmem:[%s2832_s5 + $0x2] ss:$4 sm:$0x3]  ;;  %s2256_s14 = sshll.u32 %s246_s13, 3  ;;  %vm509_vm3 = vcmask 121856  }
  0x16   : > { %s249_s17 = scalar_lea.vmem %s2827_s0, %s2256_s14  ;;  %vm392_vm4 = vcmask 130048   ;;  %vm296_vm5 = vcmask 1043456   ;;  %vm614_vm6 = vcmask 7168   ;;  %vm292_vm7 = vcmask 31744   ;;  %v2200_v51 = vld [vmem:[%s2828_s1 + $0x8] sm:$0xff] }
  0x17   : > { %v2477_v5 = vsub.s32 0, %v262_v3  ;;  %v2479_v6 = vsub.s32 1, %v262_v3  ;;  %v2489_v12 = vld [vmem:[%s249_s17] sm:$0xff]  ;;  %vm289_vm8 = vcmask 138240   ;;  %v2381_v3 = vmov 0  }
  0x18   : > { %255 = vst [vmem:[#allocation2 + $0x4] sm:$0xff] %v2489_v12  ;;  %v2502_v17 = vcombine.high %v2489_v12, %v2489_v12  ;;  %2307 = vset.pattern.permute.xlu0 %v2381_v3  ;;  %vm1001_vm9 = vcmask 916480   ;;  %vm1234_vm12 = vcmask 64512  }
  0x19   : > { %v264_v7 = vrot.slane %v259_v2, %v2477_v5  ;;  %v268_v8 = vrot.slane %v259_v2, %v2479_v6  ;;  %v483_v9 = vrot.slane %v2204_v4, %v2477_v5  ;;  %v487_v10 = vrot.slane %v2204_v4, %v2479_v6  ;;  %v1199_v2 = vld [vmem:[%s2832_s5] ss:$4 sm:$0x3] }
  0x1a   : > { %v1204_v4 = vrot.slane %v1199_v2, %v2477_v5 }
  0x1b   : > { %v269_v11 = vcombine.low %v264_v7, %v268_v8  ;;  %v488_v13 = vcombine.low %v483_v9, %v487_v10  ;;  %v989_v18 = vld [vmem:[#allocation2 + $0xc] sm:$0xf]  ;;  %v1208_v8 = vrot.slane %v1199_v2, %v2479_v6  ;;  %v2236_v9 = vld [vmem:[%s2832_s5 + $0x2] ss:$4 sm:$0x3] }
  0x1c   : > { %v783_v32 = vld [vmem:[#allocation2 + $0xc] sm:$0xf] }
  0x1d   : > { %270 = vrot.lane.b32.xlu0 %v269_v11, %s2373_s18  ;;  %594 = vrot.lane.b32.xlu1 %v269_v11, %s2374_s19  ;;  %v886_v35 = vld [vmem:[#allocation2 + $0xc] sm:$0xf] }
  0x1e   : > { %v1085_v7 = vld [vmem:[#allocation2 + $0xc] sm:$0xf] }
  0x1f   : > { %v379_v14 = vld [vmem:[#allocation2] sm:$0xff]  ;;  %v380_v15 = vld [vmem:[#allocation2 + $0x8] sm:$0xf] }
  0x20   : > { %v385_v16 = vcombine.high %v379_v14, %v379_v14  ;;  %v258_v20 = vld [vmem:[#allocation2 + $0x8] sm:$0xf] }
  0x21   : > { %489 = vrot.lane.b32.xlu0 %v488_v13, %s2375_s20  ;;  %784 = vrot.lane.b32.xlu1 %v488_v13, %s2376_s26  ;;  %v593_v22 = vld [vmem:[#allocation2 + $0x8] sm:$0xf] }
  0x22   : > { %v476_v28 = vld [vmem:[#allocation2 + $0x8] sm:$0xf] }
  0x25   : > { %887 = vrot.lane.b32.xlu0 %v269_v11, %s2377_s28  ;;  %1086 = vrot.lane.b32.xlu1 %v488_v13, %s2378_s29  ;;  %v1416_v11 = vrot.slane %v2236_v9, %v2479_v6  ;;  %v256_v13 = vld [vmem:[%s2829_s2] sm:$0xff] }
  0x29   : > { %386 = vrot.lane.b32.xlu1 %v379_v14, %s2379_s9  ;;  %390 = vrot.lane.b32.xlu0 %v380_v15, %s2379_s9 }
  0x2d   : > { %388 = vrot.lane.b32.xlu1 %v385_v16, %s2379_s9  ;;  %997 = vrot.lane.b32.xlu0 %v2502_v17, %s2380_s10 }
  0x31   : > { %999 = vrot.lane.b32.xlu1 %v989_v18, %s2380_s10 }
  0x8f   : > { %v271_v19 = vpop.permute.xlu0 %270  ;;  %v595_v21 = vpop.permute.xlu1 %594 }
  0x90   : > { %v272_v23 = vrot.slane %v271_v19, 4  ;;  %v596_v24 = vrot.slane %v595_v21, 4 }
  0x92   : > { %v278_v25 = vmul.f32 %v272_v23, %v258_v20  ;;  %v602_v26 = vmul.f32 %v596_v24, %v593_v22  ;;  %v274_v40 = vsel %vm273_vm0, %v272_v23, %v271_v19  ;;  %v598_v41 = vsel %vm597_vm1, %v596_v24, %v595_v21 }
  0x93   : > { %v490_v27 = vpop.permute.xlu0 %489  ;;  %v785_v29 = vpop.permute.xlu1 %784  ;;  %v277_v44 = vmul.f32 %v379_v14, %v274_v40  ;;  %v601_v45 = vmul.f32 %v598_v41, %v379_v14 }
  0x94   : > { %v491_v30 = vrot.slane %v490_v27, 4  ;;  %287 = vrot.lane.b32.xlu1 %v278_v25, %s2378_s29  ;;  %v786_v31 = vrot.slane %v785_v29, 4  ;;  %612 = vrot.lane.b32.xlu0 %v602_v26, %s2376_s26 }
  0x95   : > { %v607_v58 = vcombine.high %v601_v45, %v601_v45  ;;  %v282_v61 = vcombine.high %v277_v44, %v277_v44 }
  0x96   : > { %v497_v33 = vmul.f32 %v491_v30, %v476_v28  ;;  %v791_v37 = vmul.f32 %v786_v31, %v783_v32  ;;  %v493_v46 = vsel %vm492_vm2, %v491_v30, %v490_v27  ;;  %v787_v55 = vsel %vm614_vm6, %v786_v31, %v785_v29  ;;  %v2209_v29 = vld [vmem:[%s2828_s1 + $0x18] sm:$0xff] }
  0x97   : > { %v888_v34 = vpop.permute.xlu0 %887  ;;  %v2510_v36 = vpop.permute.xlu1 %1086  ;;  %v496_v53 = vmul.f32 %v493_v46, %v379_v14  ;;  %v790_v57 = vmul.f32 %v787_v55, %v2489_v12  ;;  %v1412_v14 = vrot.slane %v2236_v9, %v2477_v5  ;;  %v2217_v46 = vld [vmem:[%s2828_s1 + $0x28] sm:$0xff] }
  0x98   : > { %v889_v38 = vrot.slane %v888_v34, 4  ;;  %507 = vrot.lane.b32.xlu1 %v497_v33, %s2377_s28  ;;  %v1088_v52 = vrot.slane %v2510_v36, 4 }
  0x99   : > { %v502_v63 = vcombine.high %v496_v53, %v496_v53  ;;  %v796_v0 = vcombine.high %v790_v57, %v790_v57 }
  0x9a   : > { %v894_v39 = vmul.f32 %v889_v38, %v886_v35  ;;  %v890_v47 = vsel %vm509_vm3, %v889_v38, %v888_v34  ;;  %v1089_v56 = vsel %vm289_vm8, %v1088_v52, %v2510_v36  ;;  %v1093_v10 = vmul.f32 %v1088_v52, %v1085_v7  ;;  %v279_v34 = vld [vmem:[%s2828_s1] sm:$0xff]  ;;  %v2221_v52 = vld [vmem:[%s2828_s1 + $0x30] sm:$0xff] }
  0x9b   : > { %v387_v42 = vpop.permute.xlu1 %386  ;;  %v391_v43 = vpop.permute.xlu0 %390  ;;  %v893_v54 = vmul.f32 %v890_v47, %v2489_v12  ;;  %v1092_v59 = vmul.f32 %v1089_v56, %v2489_v12 }
  0x9c   : > { %904 = vrot.lane.b32.xlu0 %v894_v39, %s2375_s20  ;;  %801 = vrot.lane.b32.xlu1 %v791_v37, %s2374_s19  ;;  %v2205_v39 = vld [vmem:[%s2828_s1 + $0x10] sm:$0xff] }
  0x9d   : > { %v899_v60 = vcombine.high %v893_v54, %v893_v54  ;;  %v1098_v62 = vcombine.high %v1092_v59, %v1092_v59 }
  0x9f   : > { %v389_v48 = vpop.permute.xlu1 %388  ;;  %v998_v6 = vpop.permute.xlu0 %997 }
  0xa0   : > { %608 = vrot.lane.b32.xlu1 %v601_v45, %s2376_s26  ;;  %283 = vrot.lane.b32.xlu0 %v277_v44, %s2378_s29  ;;  %v394_v49 = vsel %vm392_vm4, %v389_v48, %v391_v43  ;;  %v393_v50 = vsel %vm392_vm4, %v387_v42, %v389_v48  ;;  %v2213_v45 = vld [vmem:[%s2828_s1 + $0x20] sm:$0xff] }
  0xa1   : > { %2201 = vmatprep.subr.msk.mxu1 %vm296_vm5, %v394_v49 }
  0xa2   : > { %2202 = vmatpush1.msk.msra.mxu1 %vm296_vm5, %v393_v50 }
  0xa3   : > { %2203 = vmatmul.mubr.msk.f32.vlgmr.msra.gmra.mxu1 %vm292_vm7, %v2200_v51  ;;  %v1000_v5 = vpop.permute.xlu1 %999 }
  0xa4   : > { %900 = vrot.lane.b32.xlu1 %v893_v54, %s2375_s20  ;;  %503 = vrot.lane.b32.xlu0 %v496_v53, %s2377_s28  ;;  %v1003_v47 = vsel %vm1001_vm9, %v998_v6, %v1000_v5  ;;  %v2225_v53 = vld [vmem:[%s2828_s1 + $0x38] sm:$0xff] }
  0xa5   : > { %688 = vmatprep.mubr.f32.mxu1 %v2372_v1 }
  0xa8   : > { %610 = vrot.lane.b32.xlu1 %v607_v58, %s2376_s26  ;;  %797 = vrot.lane.b32.xlu0 %v790_v57, %s2374_s19  ;;  %v2229_v57 = vld [vmem:[%s2828_s1 + $0x40] sm:$0xff] }
  0xac   : > { %902 = vrot.lane.b32.xlu1 %v899_v60, %s2375_s20  ;;  %285 = vrot.lane.b32.xlu0 %v282_v61, %s2378_s29 }
  0xb0   : > { %505 = vrot.lane.b32.xlu0 %v502_v63, %s2377_s28  ;;  %1101 = vrot.lane.b32.xlu1 %v1098_v62, %s2373_s18 }
  0xb4   : > { %799 = vrot.lane.b32.xlu0 %v796_v0, %s2374_s19  ;;  %1099 = vrot.lane.b32.xlu1 %v1092_v59, %s2373_s18 }
  0xb8   : > { %995 = vrot.lane.b32.xlu0 %v2489_v12, %s2380_s10  ;;  %1209 = vrot.lane.b32.xlu1 %v1204_v4, %s2373_s18 }
  0xbc   : > { %1103 = vrot.lane.b32.xlu0 %v1093_v10, %s2373_s18  ;;  %1211 = vrot.lane.b32.xlu1 %v1208_v8, %s2373_s18 }
  0xc0   : > { %374 = vperm.xlu0 %2307, %v256_v13   ;;  %1419 = vrot.lane.b32.xlu1 %v1416_v11, %s2375_s20 }
  0xc4   : > { %1417 = vrot.lane.b32.xlu0 %v1412_v14, %s2375_s20  ;;  %1521 = vrot.lane.b32.xlu1 %v1208_v8, %s2374_s19 }
  0xc8   : > { %1519 = vrot.lane.b32.xlu0 %v1204_v4, %s2374_s19  ;;  %1704 = vrot.lane.b32.xlu1 %v1416_v11, %s2376_s26 }
  0xcc   : > { %1702 = vrot.lane.b32.xlu0 %v1412_v14, %s2376_s26  ;;  %1806 = vrot.lane.b32.xlu1 %v1208_v8, %s2377_s28 }
  0xd0   : > { %1804 = vrot.lane.b32.xlu0 %v1204_v4, %s2377_s28  ;;  %1999 = vrot.lane.b32.xlu1 %v1416_v11, %s2378_s29 }
  0xd4   : > { %1997 = vrot.lane.b32.xlu0 %v1412_v14, %s2378_s29  ;;  %1321 = vrot.lane.b32.xlu1 %v2372_v1, %s2379_s9 }
 0x106   : > { %v288_v15 = vpop.permute.xlu1 %287  ;;  %v613_v16 = vpop.permute.xlu0 %612 }
 0x10a   : > { %v508_v18 = vpop.permute.xlu1 %507 }
 0x10e   : > { %v905_v19 = vpop.permute.xlu0 %904  ;;  %v802_v20 = vpop.permute.xlu1 %801 }
 0x112   : > { %v609_v21 = vpop.permute.xlu1 %608  ;;  %v284_v22 = vpop.permute.xlu0 %283 }
 0x116   : > { %v901_v23 = vpop.permute.xlu1 %900  ;;  %v504_v24 = vpop.permute.xlu0 %503 }
 0x11a   : > { %v611_v25 = vpop.permute.xlu1 %610  ;;  %v798_v26 = vpop.permute.xlu0 %797 }
 0x11b   : > { %v615_v27 = vsel %vm614_vm6, %v609_v21, %v611_v25  ;;  %v616_v28 = vsel %vm614_vm6, %v611_v25, %v613_v16 }
 0x11c   : > { %2210 = vmatprep.subr.msk.mxu1 %vm296_vm5, %v616_v28 }
 0x11d   : > { %2211 = vmatpush1.msk.msra.mxu1 %vm296_vm5, %v615_v27 }
 0x11e   : > { %v903_v30 = vpop.permute.xlu1 %902  ;;  %v286_v31 = vpop.permute.xlu0 %285  ;;  %2212 = vmatmul.mubr.msk.f32.vlgmr.msra.gmra.mxu1 %vm292_vm7, %v2209_v29 }
 0x11f   : > { %v291_v32 = vsel %vm289_vm8, %v286_v31, %v288_v15  ;;  %v290_v33 = vsel %vm289_vm8, %v284_v22, %v286_v31  ;;  %876 = vmatprep.mubr.f32.mxu1 %v2372_v1  ;;  %v907_v42 = vsel %vm492_vm2, %v903_v30, %v905_v19  ;;  %v906_v48 = vsel %vm492_vm2, %v901_v23, %v903_v30 }
 0x120   : > { %2197 = vmatprep.subr.msk.mxu0 %vm296_vm5, %v291_v32 }
 0x121   : > { %2198 = vmatpush1.msk.msra.mxu0 %vm296_vm5, %v290_v33 }
 0x122   : > { %2199 = vmatmul.mubr.msk.f32.vlgmr.msra.gmra.mxu0 %vm292_vm7, %v279_v34  ;;  %v506_v35 = vpop.permute.xlu0 %505  ;;  %v1102_v36 = vpop.permute.xlu1 %1101 }
 0x123   : > { %v510_v37 = vsel %vm509_vm3, %v504_v24, %v506_v35  ;;  %v511_v38 = vsel %vm509_vm3, %v506_v35, %v508_v18  ;;  %583 = vmatprep.mubr.f32.mxu0 %v2372_v1 }
 0x124   : > { %2206 = vmatprep.subr.msk.mxu0 %vm296_vm5, %v511_v38 }
 0x125   : > { %2207 = vmatpush1.msk.msra.mxu0 %vm296_vm5, %v510_v37 }
 0x126   : > { %2208 = vmatmul.mubr.msk.f32.vlgmr.msra.gmra.mxu0 %vm292_vm7, %v2205_v39  ;;  %2214 = vmatprep.subr.msk.mxu0 %vm296_vm5, %v2502_v17  ;;  %v800_v40 = vpop.permute.xlu0 %799  ;;  %v1100_v41 = vpop.permute.xlu1 %1099 }
 0x127   : > { %v803_v43 = vsel %vm597_vm1, %v798_v26, %v800_v40  ;;  %v804_v44 = vsel %vm597_vm1, %v800_v40, %v802_v20  ;;  %2215 = vmatpush1.msk.msra.mxu0 %vm296_vm5, %v2489_v12  ;;  %773 = vmatprep.mubr.f32.mxu0 %v2372_v1  ;;  %v1105_v58 = vsel %vm273_vm0, %v1100_v41, %v1102_v36 }
 0x128   : > { %2218 = vmatprep.subr.msk.mxu1 %vm296_vm5, %v804_v44  ;;  %2222 = vmatprep.subr.msk.mxu0 %vm296_vm5, %v907_v42 }
 0x129   : > { %2219 = vmatpush1.msk.msra.mxu1 %vm296_vm5, %v803_v43 }
 0x12a   : > { %2216 = vmatmul.mubr.msk.f32.vlgmr.msra.gmra.mxu0 %vm292_vm7, %v2213_v45  ;;  %2220 = vmatmul.mubr.msk.f32.vlgmr.msra.gmra.mxu1 %vm292_vm7, %v2217_v46  ;;  %v996_v49 = vpop.permute.xlu0 %995  ;;  %v2624_v50 = vpop.permute.xlu1 %1209 }
 0x12b   : > { %2223 = vmatpush1.msk.msra.mxu0 %vm296_vm5, %v906_v48  ;;  %2226 = vmatprep.subr.msk.mxu1 %vm296_vm5, %v1003_v47  ;;  %v1002_v51 = vsel %vm1001_vm9, %v996_v49, %v998_v6  ;;  %v1217_v54 = vmul.f32 0.0, %v2624_v50 }
 0x12c   : > { %2227 = vmatpush1.msk.msra.mxu1 %vm296_vm5, %v1002_v51  ;;  %979 = vmatprep.mubr.f32.mxu0 %v2372_v1 }
 0x12d   : > { %1075 = vmatprep.mubr.f32.mxu1 %v2372_v1  ;;  %1224 = vrot.lane.b32.xlu0 %v1217_v54, %s2378_s29 }
 0x12e   : > { %2224 = vmatmul.mubr.msk.f32.vlgmr.msra.gmra.mxu0 %vm292_vm7, %v2221_v52  ;;  %2228 = vmatmul.mubr.msk.f32.vlgmr.msra.gmra.mxu1 %vm292_vm7, %v2225_v53  ;;  %v1104_v55 = vpop.permute.xlu0 %1103  ;;  %v2653_v60 = vpop.permute.xlu1 %1211 }
 0x12f   : > { %v1106_v56 = vsel %vm273_vm0, %v1102_v36, %v1104_v55  ;;  %1178 = vmatprep.mubr.f32.mxu0 %v2372_v1  ;;  %1302 = vmatprep.mubr.f32.mxu1 %v2372_v1  ;;  %v1213_v47 = vsel %vm273_vm0, %v2624_v50, %v2653_v60 }
 0x130   : > { %2230 = vmatprep.subr.msk.mxu0 %vm296_vm5, %v1106_v56 }
 0x131   : > { %2231 = vmatpush1.msk.msra.mxu0 %vm296_vm5, %v1105_v58 }
 0x132   : > { %2232 = vmatmul.mubr.msk.f32.vlgmr.msra.gmra.mxu0 %vm292_vm7, %v2229_v57  ;;  %v2655_v61 = vpop.permute.xlu1 %1419 }
 0x133   : > { %1398 = vmatprep.mubr.f32.mxu0 %v2372_v1 }
 0x136   : > { %v2661_v0 = vpop.permute.xlu1 %1521 }
 0x13a   : > { %v2664_v4 = vpop.permute.xlu1 %1704 }
 0x13b   : > { %v375_v59 = vpop.permute.xlu0 %374  ;;  %v1712_v7 = vmul.f32 0.0, %v2664_v4 }
 0x13e   : > { %v2668_v8 = vpop.permute.xlu1 %1806 }
 0x13f   : > { %v2657_v62 = vpop.permute.xlu0 %1417  ;;  %v1814_v9 = vmul.f32 0.0, %v2668_v8 }
 0x140   : > { %v1425_v63 = vmul.f32 0.0, %v2657_v62  ;;  %v1421_v57 = vsel %vm492_vm2, %v2657_v62, %v2655_v61 }
 0x142   : > { %1433 = vrot.lane.b32.xlu0 %v1425_v63, %s2377_s28 }
 0x143   : > { %v1520_v2 = vpop.permute.xlu0 %1519 }
 0x144   : > { %v1527_v3 = vmul.f32 0.0, %v1520_v2  ;;  %v1523_v52 = vsel %vm597_vm1, %v1520_v2, %v2661_v0 }
 0x146   : > { %1535 = vrot.lane.b32.xlu1 %v1527_v3, %s2376_s26  ;;  %1824 = vrot.lane.b32.xlu0 %v1814_v9, %s2375_s20  ;;  %v2000_v3 = vpop.permute.xlu1 %1999 }
 0x147   : > { %v1703_v48 = vpop.permute.xlu0 %1702 }
 0x148   : > { %v1706_v9 = vsel %vm614_vm6, %v1703_v48, %v2664_v4  ;;  %v1195_v4 = vld [vmem:[%s2831_s4] sm:$0xf] }
 0x14a   : > { %1722 = vrot.lane.b32.xlu1 %v1712_v7, %s2374_s19 }
 0x14b   : > { %v1805_v50 = vpop.permute.xlu0 %1804 }
 0x14c   : > { %v1808_v7 = vsel %vm509_vm3, %v1805_v50, %v2668_v8  ;;  %v2007_v8 = vmul.f32 0.0, %v2000_v3 }
 0x14f   : > { %v1998_v62 = vpop.permute.xlu0 %1997 }
 0x163   : > { %v468_v10 = vpop.f32.mrf.mxu1 }
 0x165   : > { %v470_v11 = vpop.f32.mrf.mxu1 }
 0x1de   : > { %v690_v14 = vpop.f32.mrf.mxu1 }
 0x1e0   : > { %v692_v19 = vpop.f32.mrf.mxu1 }
 0x1e2   : > { %v367_v13 = vpop.f32.mrf.mxu0 }
 0x1e3   : > { %v377_v5 = vadd.f32 %v375_v59, %v367_v13 }
 0x1e4   : > { %v369_v6 = vpop.f32.mrf.mxu0 }
 0x1e5   : > { %v378_v15 = vadd.f32 %v375_v59, %v369_v6  ;;  %v473_v16 = vadd.f32 %v468_v10, %v377_v5  ;;  %v2001_v10 = vsel %vm289_vm8, %v1998_v62, %v2000_v3  ;;  %v1225_v5 = vpop.permute.xlu0 %1224 }
 0x1e6   : > { %v585_v18 = vpop.f32.mrf.mxu0 }
 0x1e7   : > { %v474_v20 = vadd.f32 %v470_v11, %v378_v15  ;;  %v590_v21 = vadd.f32 %v585_v18, %v473_v16 }
 0x1e8   : > { %v587_v22 = vpop.f32.mrf.mxu0 }
 0x1e9   : > { %v695_v23 = vadd.f32 %v690_v14, %v590_v21  ;;  %v591_v24 = vadd.f32 %v587_v22, %v474_v20  ;;  %v1322_v14 = vpop.permute.xlu1 %1321  ;;  %v1434_v15 = vpop.permute.xlu0 %1433 }
 0x1ea   : > { %v775_v25 = vpop.f32.mrf.mxu0  ;;  %v878_v26 = vpop.f32.mrf.mxu1 }
 0x1eb   : > { %v696_v27 = vadd.f32 %v692_v19, %v591_v24  ;;  %v780_v28 = vadd.f32 %v775_v25, %v695_v23  ;;  %v2234_v24 = vld [vmem:[%s2830_s3 + $0x4] sm:$0xf] }
 0x1ec   : > { %v777_v29 = vpop.f32.mrf.mxu0  ;;  %v880_v30 = vpop.f32.mrf.mxu1 }
 0x1ed   : > { %v883_v31 = vadd.f32 %v878_v26, %v780_v28  ;;  %v781_v32 = vadd.f32 %v777_v29, %v696_v27  ;;  %v1536_v6 = vpop.permute.xlu1 %1535  ;;  %v1825_v18 = vpop.permute.xlu0 %1824 }
 0x1ee   : > { %v981_v33 = vpop.f32.mrf.mxu0  ;;  %v1077_v34 = vpop.f32.mrf.mxu1 }
 0x1ef   : > { %v884_v35 = vadd.f32 %v880_v30, %v781_v32  ;;  %v986_v36 = vadd.f32 %v981_v33, %v883_v31  ;;  %v1220_v30 = vld [vmem:[%s2830_s3] sm:$0xf] }
 0x1f0   : > { %v983_v37 = vpop.f32.mrf.mxu0  ;;  %v1079_v40 = vpop.f32.mrf.mxu1 }
 0x1f1   : > { %v1082_v38 = vadd.f32 %v1077_v34, %v986_v36  ;;  %v987_v39 = vadd.f32 %v983_v37, %v884_v35  ;;  %v1723_v16 = vpop.permute.xlu1 %1722  ;;  %v2237_v35 = vld [vmem:[%s2830_s3 + $0x8] sm:$0xf] }
 0x1f2   : > { %v1180_v41 = vpop.f32.mrf.mxu0 }
 0x1f3   : > { %v1083_v42 = vadd.f32 %v1079_v40, %v987_v39  ;;  %v1185_v43 = vadd.f32 %v1180_v41, %v1082_v38  ;;  %v2241_v39 = vld [vmem:[%s2830_s3 + $0x10] sm:$0xf] }
 0x1f4   : > { %v1182_v44 = vpop.f32.mrf.mxu0 }
 0x1f5   : > { %vm1187_vm10 = vcmp.ge.f32.partialorder %v1185_v43, 0.0  ;;  %v1189_v45 = vmul.f32 0.01, %v1185_v43  ;;  %v1186_v46 = vadd.f32 %v1182_v44, %v1083_v42  ;;  %v2239_v42 = vld [vmem:[%s2830_s3 + $0xc] sm:$0xf] }
 0x1f7   : > { %v2675_v49 = vsel %vm1187_vm10, %v1185_v43, %v1189_v45  ;;  %v1190_v53 = vmul.f32 0.01, %v1186_v46  ;;  %vm1188_vm11 = vcmp.ge.f32.partialorder %v1186_v46, 0.0 }
 0x1f8   : > { %1323 = vrot.lane.b32.xlu1 %v2675_v49, %s2379_s9  ;;  %v1218_v51 = vmul.f32 %v1213_v47, %v2675_v49  ;;  %v1528_v54 = vmul.f32 %v1523_v52, %v2675_v49  ;;  %v1812_v56 = vmul.f32 %v1805_v50, %v2675_v49  ;;  %v1426_v58 = vmul.f32 %v1421_v57, %v2675_v49  ;;  %v2245_v47 = vld [vmem:[%s2830_s3 + $0x18] sm:$0xf]  ;;  %v2243_v52 = vld [vmem:[%s2830_s3 + $0x14] sm:$0xf] }
 0x1f9   : > { %v2685_v55 = vsel %vm1188_vm11, %v1186_v46, %v1190_v53  ;;  %v1710_v63 = vmul.f32 %v1703_v48, %v2675_v49 }
 0x1fa   : > { %1226 = vrot.lane.b32.xlu0 %v1218_v51, %s2378_s29  ;;  %v1219_v59 = vmul.f32 %v2653_v60, %v2685_v55  ;;  %v1427_v2 = vmul.f32 %v2655_v61, %v2685_v55  ;;  %v1529_v60 = vmul.f32 %v2661_v0, %v2685_v55  ;;  %v1813_v61 = vmul.f32 %v1808_v7, %v2685_v55 }
 0x1fb   : > { %v1711_v11 = vmul.f32 %v1706_v9, %v2685_v55  ;;  %v2006_v13 = vmul.f32 %v2001_v10, %v2685_v55  ;;  %v2005_v0 = vmul.f32 %v1998_v62, %v2675_v49 }
 0x1fc   : > { %1537 = vrot.lane.b32.xlu1 %v1528_v54, %s2376_s26 }
 0x1fe   : > { %1325 = vrot.lane.b32.xlu0 %v2685_v55, %s2379_s9 }
 0x200   : > { %1820 = vrot.lane.b32.xlu1 %v1812_v56, %s2375_s20  ;;  %v2247_v56 = vld [vmem:[%s2830_s3 + $0x1c] sm:$0xf] }
 0x202   : > { %1435 = vrot.lane.b32.xlu0 %v1426_v58, %s2377_s28 }
 0x204   : > { %1228 = vrot.lane.b32.xlu1 %v1219_v59, %s2378_s29  ;;  %s242_s29 = sand.u32 1, %s2362_s22  }
 0x205   : > { %s2194_s9 = sshll.u32 %s242_s29, 3  ;;  %s2117_s12 = scalar_lea.sflag [#allocation5], %s242_s29 }
 0x206   : > { %1718 = vrot.lane.b32.xlu0 %v1710_v63, %s2374_s19  ;;  %v2249_v63 = vld [vmem:[%s2830_s3 + $0x20] sm:$0xf]  ;;  %s244_s14 = scalar_lea.vmem [#allocation4], %s2194_s9 }
 0x207   : > { %s2131_s15 = sshll.u32 %s244_s14, 4  ;;  %s2132_s15 = int_to_ptr.vmem [resolvable:$true] %s2131_s15 }
 0x208   : > { %1437 = vrot.lane.b32.xlu1 %v1427_v2, %s2377_s28  ;;  %s2310_s13 = scalar_lea.vmem %s2132_s15, 128 }
 0x209   : > { %p2311_p11 = scmp.ne.s32.totalorder %s2132_s15, %s2310_s13 }
 0x20a   : > { %1913 = vrot.lane.b32.xlu0 %v2685_v55, %s2380_s10 }
 0x20b   : > { %p2312_p12 = pnand %p2311_p11, %p2456_p5 }
 0x20c   : > { %1915 = vrot.lane.b32.xlu1 %v2372_v1, %s2380_s10 }
 0x20d   : > { %p2313_p13 = pneg %p2312_p12 }
 0x20e   : > { %1539 = vrot.lane.b32.xlu0 %v1529_v60, %s2376_s26  ;;  %s2382_s26 = smov [#allocation4]  }
 0x210   : > { %1822 = vrot.lane.b32.xlu1 %v1813_v61, %s2375_s20  ;;  %s2314_s20 = sshll.u32 %s2382_s26, 4  ;;  %s2315_s20 = int_to_ptr.vmem [resolvable:$false] %s2314_s20 }
 0x211   : > { %p2317_p0 = scmp.lt.s32.totalorder %s2132_s15, %s2315_s20 }
 0x212   : > { %1720 = vrot.lane.b32.xlu0 %v1711_v11, %s2374_s19 }
 0x214   : > { %2015 = vrot.lane.b32.xlu1 %v2006_v13, %s2373_s18 }
 0x216   : > { %1911 = vrot.lane.b32.xlu0 %v2675_v49, %s2380_s10  ;;  %s2257_s10 = sshll.u32 %s2439_s25, 7  ;;  %s2316_s25 = scalar_lea.vmem %s2315_s20, 256 }
 0x217   : > { %s2129_s11 = scalar_lea.hbm %s2833_s6, %s2257_s10  ;;  %p2318_p1 = scmp.lt.s32.totalorder %s2316_s25, %s2310_s13 }
 0x218   : > { %2013 = vrot.lane.b32.xlu1 %v2005_v0, %s2373_s18 }
 0x219   : > { %p2319_p2 = por %p2318_p1, %p2317_p0 }
 0x21a   : > { %2017 = vrot.lane.b32.xlu0 %v2007_v8, %s2373_s18 }
 0x21b   : > { %p2320_p3 = pnand %p2319_p2, %p2313_p13 }
 0x21e   : > { %1311 = vperm.xlu0 %2307, %v1195_v4  }
 0x26a   : > { %v1324_v19 = vpop.permute.xlu1 %1323 }
 0x26b   : > { %v1327_v25 = vsel %vm392_vm4, %v1322_v14, %v1324_v19 }
 0x26c   : > { %v1227_v20 = vpop.permute.xlu0 %1226 }
 0x26d   : > { %v1230_v31 = vsel %vm289_vm8, %v1225_v5, %v1227_v20 }
 0x26e   : > { %v1538_v21 = vpop.permute.xlu1 %1537 }
 0x26f   : > { %v1541_v43 = vsel %vm614_vm6, %v1536_v6, %v1538_v21 }
 0x270   : > { %v1326_v22 = vpop.permute.xlu0 %1325 }
 0x271   : > { %v1328_v23 = vsel %vm392_vm4, %v1324_v19, %v1326_v22 }
 0x272   : > { %v1821_v26 = vpop.permute.xlu1 %1820  ;;  %1364 = vmatprep.subr.mxu0 %v1328_v23 }
 0x273   : > { %1365 = vmatpush1.msra.mxu0 %v1327_v25 }
 0x274   : > { %v1436_v27 = vpop.permute.xlu0 %1435  ;;  %2235 = vmatmul.mubr.msk.f32.vlgmr.msra.gmra.mxu0 %vm1234_vm12, %v2234_v24 }
 0x275   : > { %1612 = vmatprep.mubr.f32.mxu0 %v2372_v1  ;;  %v1439_v36 = vsel %vm509_vm3, %v1434_v15, %v1436_v27 }
 0x276   : > { %v1229_v28 = vpop.permute.xlu1 %1228 }
 0x277   : > { %v1231_v29 = vsel %vm289_vm8, %v1227_v20, %v1229_v28 }
 0x278   : > { %1268 = vmatprep.subr.mxu1 %v1231_v29  ;;  %v1719_v32 = vpop.permute.xlu0 %1718 }
 0x279   : > { %1269 = vmatpush1.msra.mxu1 %v1230_v31 }
 0x27a   : > { %v1438_v33 = vpop.permute.xlu1 %1437  ;;  %2233 = vmatmul.mubr.msk.f32.vlgmr.msra.gmra.mxu1 %vm1234_vm12, %v1220_v30 }
 0x27b   : > { %v1440_v34 = vsel %vm509_vm3, %v1436_v27, %v1438_v33  ;;  %1510 = vmatprep.mubr.f32.mxu1 %v2372_v1 }
 0x27c   : > { %1476 = vmatprep.subr.mxu1 %v1440_v34  ;;  %v1914_v37 = vpop.permute.xlu0 %1913 }
 0x27d   : > { %1477 = vmatpush1.msra.mxu1 %v1439_v36 }
 0x27e   : > { %v1916_v38 = vpop.permute.xlu1 %1915  ;;  %2238 = vmatmul.mubr.msk.f32.vlgmr.msra.gmra.mxu1 %vm1234_vm12, %v2237_v35  ;;  %1656 = vmatprep.subr.mxu1 %v2685_v55 }
 0x27f   : > { %1657 = vmatpush1.msra.mxu1 %v2675_v49  ;;  %1690 = vmatprep.mubr.f32.mxu1 %v2372_v1  ;;  %v1918_v54 = vsel %vm1001_vm9, %v1914_v37, %v1916_v38 }
 0x280   : > { %v1540_v40 = vpop.permute.xlu0 %1539 }
 0x281   : > { %v1542_v41 = vsel %vm614_vm6, %v1538_v21, %v1540_v40 }
 0x282   : > { %v1823_v44 = vpop.permute.xlu1 %1822  ;;  %1578 = vmatprep.subr.mxu0 %v1542_v41  ;;  %2242 = vmatmul.mubr.msk.f32.vlgmr.msra.gmra.mxu1 %vm1234_vm12, %v2241_v39 }
 0x283   : > { %v1826_v45 = vsel %vm492_vm2, %v1821_v26, %v1823_v44  ;;  %1579 = vmatpush1.msra.mxu0 %v1541_v43  ;;  %v1827_v46 = vsel %vm492_vm2, %v1823_v44, %v1825_v18  ;;  %1897 = vmatprep.mubr.f32.mxu1 %v2372_v1 }
 0x284   : > { %2240 = vmatmul.mubr.msk.f32.vlgmr.msra.gmra.mxu0 %vm1234_vm12, %v2239_v42  ;;  %1863 = vmatprep.subr.mxu1 %v1827_v46  ;;  %v1721_v48 = vpop.permute.xlu0 %1720 }
 0x285   : > { %v1724_v49 = vsel %vm597_vm1, %v1719_v32, %v1721_v48  ;;  %1864 = vmatpush1.msra.mxu1 %v1826_v45  ;;  %v1725_v51 = vsel %vm597_vm1, %v1721_v48, %v1723_v16  ;;  %1795 = vmatprep.mubr.f32.mxu0 %v2372_v1 }
 0x286   : > { %v2016_v53 = vpop.permute.xlu1 %2015  ;;  %1761 = vmatprep.subr.mxu0 %v1725_v51  ;;  %2246 = vmatmul.mubr.msk.f32.vlgmr.msra.gmra.mxu1 %vm1234_vm12, %v2245_v47 }
 0x287   : > { %1762 = vmatpush1.msra.mxu0 %v1724_v49  ;;  %2090 = vmatprep.mubr.f32.mxu1 %v2372_v1 }
 0x288   : > { %2244 = vmatmul.mubr.msk.f32.vlgmr.msra.gmra.mxu0 %vm1234_vm12, %v2243_v52  ;;  %1954 = vmatprep.subr.mxu0 %v1918_v54  ;;  %v1912_v50 = vpop.permute.xlu0 %1911 }
 0x289   : > { %v1917_v55 = vsel %vm1001_vm9, %v1912_v50, %v1914_v37  ;;  %1988 = vmatprep.mubr.f32.mxu0 %v2372_v1 }
 0x28a   : > { %1955 = vmatpush1.msra.mxu0 %v1917_v55  ;;  %v2014_v57 = vpop.permute.xlu1 %2013 }
 0x28b   : > { %v2019_v2 = vsel %vm273_vm0, %v2014_v57, %v2016_v53 }
 0x28c   : > { %2248 = vmatmul.mubr.msk.f32.vlgmr.msra.gmra.mxu0 %vm1234_vm12, %v2247_v56  ;;  %v2018_v58 = vpop.permute.xlu0 %2017 }
 0x28d   : > { %v2020_v59 = vsel %vm273_vm0, %v2016_v53, %v2018_v58 }
 0x28e   : > { %2056 = vmatprep.subr.mxu1 %v2020_v59 }
 0x28f   : > { %2057 = vmatpush1.msra.mxu1 %v2019_v2 }
 0x290   : > { %2250 = vmatmul.mubr.msk.f32.vlgmr.msra.gmra.mxu1 %vm1234_vm12, %v2249_v63 }
 0x299   : > { %v1312_v1 = vpop.permute.xlu0 %1311 }
 0x334   : > { %v1400_v3 = vpop.f32.mrf.mxu0 }
 0x336   : > { %v1402_v9 = vpop.f32.mrf.mxu0 }
 0x33a   : > { %v1304_v62 = vpop.f32.mrf.mxu1 }
 0x33b   : > { %v1314_v60 = vadd.f32 %v1312_v1, %v1304_v62 }
 0x33c   : > { %v1306_v7 = vpop.f32.mrf.mxu1 }
 0x33d   : > { %v1315_v61 = vadd.f32 %v1312_v1, %v1306_v7  ;;  %v1405_v11 = vadd.f32 %v1400_v3, %v1314_v60 }
 0x33e   : > { %v1512_v10 = vpop.f32.mrf.mxu1 }
 0x33f   : > { %v1406_v0 = vadd.f32 %v1402_v9, %v1315_v61  ;;  %v1517_v4 = vadd.f32 %v1512_v10, %v1405_v11 }
 0x340   : > { %v1514_v13 = vpop.f32.mrf.mxu1 }
 0x341   : > { %v1518_v6 = vadd.f32 %v1514_v13, %v1406_v0 }
 0x342   : > { %v1692_v8 = vpop.f32.mrf.mxu1 }
 0x344   : > { %v1614_v14 = vpop.f32.mrf.mxu0  ;;  %v1694_v5 = vpop.f32.mrf.mxu1 }
 0x345   : > { %v1619_v15 = vadd.f32 %v1614_v14, %v1517_v4 }
 0x346   : > { %v1616_v16 = vpop.f32.mrf.mxu0  ;;  %v1899_v18 = vpop.f32.mrf.mxu1 }
 0x347   : > { %v1620_v19 = vadd.f32 %v1616_v16, %v1518_v6  ;;  %v1697_v20 = vadd.f32 %v1692_v8, %v1619_v15 }
 0x348   : > { %v1797_v21 = vpop.f32.mrf.mxu0  ;;  %v1901_v25 = vpop.f32.mrf.mxu1 }
 0x349   : > { %v1698_v22 = vadd.f32 %v1694_v5, %v1620_v19  ;;  %v1802_v23 = vadd.f32 %v1797_v21, %v1697_v20 }
 0x34a   : > { %v1799_v24 = vpop.f32.mrf.mxu0 }
 0x34b   : > { %v1803_v26 = vadd.f32 %v1799_v24, %v1698_v22  ;;  %v1904_v27 = vadd.f32 %v1899_v18, %v1802_v23 }
 0x34c   : > { %v1990_v28 = vpop.f32.mrf.mxu0 }
 0x34d   : > { %v1905_v29 = vadd.f32 %v1901_v25, %v1803_v26  ;;  %v1995_v31 = vadd.f32 %v1990_v28, %v1904_v27 }
 0x34e   : > { %v1992_v30 = vpop.f32.mrf.mxu0 }
 0x34f   : > { %v1996_v33 = vadd.f32 %v1992_v30, %v1905_v29 }
 0x350   : > { %v2092_v32 = vpop.f32.mrf.mxu1 }
 0x351   : > { %v2097_v34 = vadd.f32 %v2092_v32, %v1995_v31 }
 0x352   : > { %v2094_v35 = vpop.f32.mrf.mxu1 }
 0x353   : > { %v2103_v36 = vadd.f32 %v2097_v34, %v2489_v12  ;;  %v2098_v37 = vadd.f32 %v2094_v35, %v1996_v33 }
 0x355   : > { %v2107_v38 = vmul.f32 0.01, %v2103_v36  ;;  %v2104_v39 = vadd.f32 %v2098_v37, %v2502_v17  ;;  %vm2105_vm13 = vcmp.ge.f32.partialorder %v2103_v36, 0.0 }
 0x357   : > { %vm2106_vm14 = vcmp.ge.f32.partialorder %v2104_v39, 0.0  ;;  %v2108_v40 = vmul.f32 0.01, %v2104_v39  ;;  %v2109_v41 = vsel %vm2105_vm13, %v2103_v36, %v2107_v38 }
 0x359   : > { %v2110_v42 = vsel %vm2106_vm14, %v2104_v39, %v2108_v40 }
 0x35a   : > { %v2113_v43 = vcombine.low %v2109_v41, %v2110_v42 }
 0x35c   : > { %2115 = vst [vmem:[%s244_s14] sm:$0xff] %v2113_v43 }
 0x35d   : > { %2323 = shalt.err (!%p2320_p3)
}
 0x35e   : > { %s2324_s19 = scalar_lea.hbm %s2129_s11, 128  ;;  %s2328_s29 = scalar_lea.hbm %s2833_s6, 256 }
 0x35f   : > { %p2325_p4 = scmp.ne.s32.totalorder %s2129_s11, %s2324_s19  ;;  %p2329_p9 = scmp.lt.s32.totalorder %s2129_s11, %s2833_s6 }
 0x360   : > { %p2330_p10 = scmp.lt.s32.totalorder %s2328_s29, %s2324_s19 }
 0x361   : > { %p2326_p7 = pnand %p2325_p4, %p2456_p5 }
 0x362   : > { %p2331_p11 = por %p2330_p10, %p2329_p9 }
 0x363   : > { %p2327_p8 = pneg %p2326_p7 }
 0x365   : > { %p2332_p12 = pnand %p2331_p11, %p2327_p8 }
 0x367   : > { %2335 = shalt.err (!%p2332_p12)
}
 0x368   : > { %2258 = dma.vmem_to_hbm [thread:$0]  (%p2456_p5), %s2132_s15, 128, %s2129_s11, %s2117_s12  }
 0x369 PF: > { %p2264_p13 = scmp.ge.s32.totalorder %s2370_s24, 2  ;;  %s2143_s14 = sand.u32 1, %s2358_s21  }
 0x36a   : > { %s2144_s16 = scalar_lea.sflag [#allocation5], %s2143_s14 }
 0x36b   : > { %p2261_p0 = pnand %p2264_p13, %p2460_p6 }
 0x36d   : > { %p2262_p1 = pneg %p2261_p0 }
 0x36f   : > { %2353 = dma.done.wait (%p2262_p1), %s2144_s16, 128  }
 0x370   : > { %2355 = vsyncadd (%p2262_p1), %s2144_s16, 4294967168  ;;  %p16_p2 = scmp.ge.s32.totalorder %s2443_s27, 4   ;;  %s2836_s21 = smov %s2362_s22 }
 0x371   : > { %s2837_s22 = smov %s2366_s23  ;;  %s2838_s23 = smov %s2454_s30 }
 0x372   : > { %s2839_s24 = smov %s2443_s27  ;;  %18 = sbr.rel (!%p16_p2) target bundleno = 3 (0x3), region = 96 }
 0x377   :  { %2149 = vsyncpa [#allocation5], 1 }
 0x378   :  { %2151 = vsyncpa [#allocation5 + $0x1], 1 }

</bundles_post_ra>
